<compile_context>
chip_gen: v5e
topology: v5e:2x2
jax: 0.10.0
libtpu: 0.0.40
codegen_flags: <defaults>
</compile_context>

<pallas_src>
import functools

import jax
import jax.numpy as jnp
from jax.experimental import pallas as pl
from jax.experimental.pallas import tpu as pltpu

C_HID = 128                    # conv channels (fixed by the module)
NEG_SLOPE = 0.01               # nn.LeakyReLU default
LANE = 128
SUBLANE = 8
TARGET_ROWS = 2048             # matmul M rows per grid step (review: 2048-4096;
                               # 2048 keeps peak f32 temporaries ~10-20 MiB,
                               # comfortably inside v7x's 64 MiB VMEM)
VMEM_LIMIT_BYTES = 48 * 1024 * 1024


def _round_up(a, b):
    return (a + b - 1) // b * b


def _cdiv(a, b):
    return (a + b - 1) // b


@functools.lru_cache(maxsize=1)
def _num_tensorcores():
    """Best-effort TensorCore-per-chip count (v7x has 2; v5e/v6e have 1)."""
    try:
        info = pltpu.get_tpu_info()
    except Exception:
        return 1
    for name in ("num_cores", "num_tensorcores", "tensorcore_count", "core_count"):
        n = getattr(info, name, None)
        if isinstance(n, int) and n > 0:
            return n
    return 1


# -----------------------------------------------------------------------------
# Kernel: one grid step == BB batch elements.  conv1/bn1/act, conv2/bn2/act,
# conv3/bn3/act, global max pool over the sequence, final FC matmul.
# -----------------------------------------------------------------------------
def _cnn_text_kernel(x_ref,                    # (BB*Lp, Ep)   bf16, pre-padded
                     w1_ref, b1_ref,           # (3, Ep, C) bf16, (1, C)   f32
                     w2_ref, b2_ref,           # (4*C, C)   bf16, (1, C)   f32
                     w3_ref, b3_ref,           # (5*C, C)   bf16, (1, C)   f32
                     wfc_ref, bfc_ref,         # (C, NCp)   bf16, (1, NCp) f32
                     o_ref,                    # (1, BB, NCp)  f32
                     *, L, Lp, BB):
    M = BB * Lp
    C = w1_ref.shape[2]
    L1, L2, L3 = L, L - 1, L - 3          # conv1/2/3 valid output lengths

    # Per-example sequence index of every flattened row (sublane axis).
    local = jax.lax.broadcasted_iota(jnp.int32, (M, 1), 0) % Lp

    def lrelu(v):
        # 2 VALU passes (mul + max) instead of cmp + mul + select.
        return jnp.maximum(v, NEG_SLOPE * v)

    def rollrows(v, s):
        # result[r] = v[r - s].  Wrap-around rows only ever land in positions
        # that are zero-masked before (or while) they are consumed.
        s = s % M
        return v if s == 0 else pltpu.roll(v, shift=s, axis=0)

    # ---- conv1 (k=3, pad=1) + folded BN1 + LeakyReLU -------------------------
    # x already carries its zero halo (local row 0 and rows > L), so tap k is a
    # pure up-shift by k.  Roll the f32 PARTIAL PRODUCTS rather than the bf16
    # input: no cast passes and no packed-sublane bf16 rotates needed.
    x = x_ref[...]
    acc = jnp.dot(x, w1_ref[0], preferred_element_type=jnp.float32)
    for k in range(1, 3):
        acc = acc + rollrows(
            jnp.dot(x, w1_ref[k], preferred_element_type=jnp.float32), -k)
    y = lrelu(acc + b1_ref[...])

    # ---- conv2 (k=4, pad=1) + BN2 + LeakyReLU: im2col ------------------------
    # Zero everything outside the L1 valid rows; the +1 shift of tap 0 then
    # pulls a zeroed row into each example's left-pad slot (no scratch needed).
    # The 4 shifted bf16 slabs are lane-concatenated and contracted in ONE
    # (M, 4C) @ (4C, C) MXU matmul against wrapper-pre-stacked weights.
    y = jnp.where(local < L1, y, 0.0)
    taps = [rollrows(y, 1 - k).astype(jnp.bfloat16) for k in range(4)]
    y = lrelu(jnp.dot(jnp.concatenate(taps, axis=1), w2_ref[...],
                      preferred_element_type=jnp.float32) + b2_ref[...])

    # ---- conv3 (k=5, pad=1) + BN3 + LeakyReLU: im2col ------------------------
    y = jnp.where(local < L2, y, 0.0)
    taps = [rollrows(y, 1 - k).astype(jnp.bfloat16) for k in range(5)]
    y = lrelu(jnp.dot(jnp.concatenate(taps, axis=1), w3_ref[...],
                      preferred_element_type=jnp.float32) + b3_ref[...])

    # ---- global max pool over the L3 valid positions of each example --------
    y = jnp.where(local < L3, y, -jnp.inf)
    feat = jnp.max(y.reshape(BB, Lp, C), axis=1)          # (BB, C)

    # ---- fc: (BB, C) @ (C, NCp) + bias, lane-dense slab store ----------------
    logits = jnp.dot(feat.astype(jnp.bfloat16), wfc_ref[...],
                     preferred_element_type=jnp.float32) + bfc_ref[...]
    o_ref[0] = logits.astype(o_ref.dtype)


# -----------------------------------------------------------------------------
# Wrapper: BN folding / padding / weight stacking is glue; the hot path runs in
# the kernel.
# -----------------------------------------------------------------------------
def _fold_conv_bn(w, b, gamma, beta, mean, var, eps=1e-5):
    # w: (Cout, Cin, K) PyTorch Conv1d layout -> (K, Cin, Cout), BN scale folded
    # into the weights in f32 (cast to bf16 happens once, later).
    s = gamma * jax.lax.rsqrt(var + eps)                          # (Cout,)
    shift = beta + s * (b - mean)                                 # (Cout,)
    wk = jnp.transpose(w, (2, 1, 0)).astype(jnp.float32) * s      # (K, Cin, Cout)
    return wk, shift.reshape(1, -1).astype(jnp.float32)


@jax.jit
def cnn_text_classifier_forward(x, params):
    B, L, E = x.shape
    assert L >= 4, "conv3 output length (L - 3) must be >= 1"
    C = C_HID
    NC = params["fc_w"].shape[0]
    Ep = _round_up(E, LANE)
    NCp = _round_up(NC, LANE)
    Lp = _round_up(L + 2, SUBLANE)        # per-example sublane stride

    # Batch-block size: flatten (BB, Lp) into the matmul M dimension.
    BB = max(1, min(B, max(1, TARGET_ROWS // Lp)))
    nblk = _cdiv(B, BB)
    if nblk == 1 and BB > 1 and _num_tensorcores() > 1:
        # Only dual-TensorCore chips (v7x) benefit from a forced >=2-step grid
        # (dimension_semantics=("parallel",) shards it across the cores).
        BB = _cdiv(B, 2)
        nblk = _cdiv(B, BB)
    B_pad = nblk * BB
    M = BB * Lp

    # Input slab in bf16: zero left-pad row at local index 0, data at locals
    # 1..L, zeros beyond, embedding dim zero-padded to a full 128-lane tile.
    x_pad = jnp.zeros((B_pad, Lp, Ep), jnp.bfloat16)
    x_pad = x_pad.at[:B, 1:L + 1, :E].set(x.astype(jnp.bfloat16))
    x_flat = x_pad.reshape(B_pad * Lp, Ep)

    # Fold eval-mode BN into the conv weights (f32), then cast to bf16 once.
    w1, b1 = _fold_conv_bn(params["conv1_w"], params["conv1_b"],
                           params["bn1_gamma"], params["bn1_beta"],
                           params["bn1_mean"], params["bn1_var"])
    w2, b2 = _fold_conv_bn(params["conv2_w"], params["conv2_b"],
                           params["bn2_gamma"], params["bn2_beta"],
                           params["bn2_mean"], params["bn2_var"])
    w3, b3 = _fold_conv_bn(params["conv3_w"], params["conv3_b"],
                           params["bn3_gamma"], params["bn3_beta"],
                           params["bn3_mean"], params["bn3_var"])
    w1p = jnp.zeros((3, Ep, C), jnp.bfloat16).at[:, :E, :].set(
        w1.astype(jnp.bfloat16))
    w2s = w2.reshape(4 * C, C).astype(jnp.bfloat16)    # im2col-stacked (K*C, C)
    w3s = w3.reshape(5 * C, C).astype(jnp.bfloat16)
    wfc = jnp.zeros((C, NCp), jnp.bfloat16).at[:, :NC].set(
        jnp.transpose(params["fc_w"]).astype(jnp.bfloat16))
    bfc = jnp.zeros((1, NCp), jnp.float32).at[:, :NC].set(
        params["fc_b"].astype(jnp.float32))

    kernel = functools.partial(_cnn_text_kernel, L=L, Lp=Lp, BB=BB)

    in_specs = [
        pl.BlockSpec((M, Ep), lambda i: (i, 0)),          # x: only per-step stream
        pl.BlockSpec((3, Ep, C), lambda i: (0, 0, 0)),    # weights stay resident
        pl.BlockSpec((1, C), lambda i: (0, 0)),
        pl.BlockSpec((4 * C, C), lambda i: (0, 0)),
        pl.BlockSpec((1, C), lambda i: (0, 0)),
        pl.BlockSpec((5 * C, C), lambda i: (0, 0)),
        pl.BlockSpec((1, C), lambda i: (0, 0)),
        pl.BlockSpec((C, NCp), lambda i: (0, 0)),
        pl.BlockSpec((1, NCp), lambda i: (0, 0)),
    ]
    out_specs = pl.BlockSpec((1, BB, NCp), lambda i: (i, 0, 0))

    out = pl.pallas_call(
        kernel,
        out_shape=jax.ShapeDtypeStruct((nblk, BB, NCp), jnp.float32),
        grid_spec=pltpu.PrefetchScalarGridSpec(
            num_scalar_prefetch=0,
            grid=(nblk,),
            in_specs=in_specs,
            out_specs=out_specs,
        ),
        compiler_params=pltpu.CompilerParams(
            dimension_semantics=("parallel",),
            vmem_limit_bytes=VMEM_LIMIT_BYTES,
        ),
    )(x_flat, w1p, b1, w2s, b2, w3s, b3, wfc, bfc)

    return out.reshape(B_pad, NCp)[:B, :NC]


# -----------------------------------------------------------------------------
# Deterministic parameter init (PyTorch layouts, raw / unfolded).
# -----------------------------------------------------------------------------
def init_params(key, embedding_dim, num_classes):
    C = C_HID
    ks = iter(jax.random.split(key, 32))
    p = {}
    for li, (cin, k) in enumerate([(embedding_dim, 3), (C, 4), (C, 5)], start=1):
        p[f"conv{li}_w"] = 0.05 * jax.random.normal(next(ks), (C, cin, k), jnp.float32)
        p[f"conv{li}_b"] = 0.05 * jax.random.normal(next(ks), (C,), jnp.float32)
        p[f"bn{li}_gamma"] = 1.0 + 0.1 * jax.random.normal(next(ks), (C,), jnp.float32)
        p[f"bn{li}_beta"] = 0.1 * jax.random.normal(next(ks), (C,), jnp.float32)
        p[f"bn{li}_mean"] = 0.1 * jax.random.normal(next(ks), (C,), jnp.float32)
        p[f"bn{li}_var"] = jax.random.uniform(next(ks), (C,), jnp.float32, 0.5, 1.5)
    p["fc_w"] = 0.05 * jax.random.normal(next(ks), (num_classes, C), jnp.float32)
    p["fc_b"] = 0.05 * jax.random.normal(next(ks), (num_classes,), jnp.float32)
    return p


# -----------------------------------------------------------------------------
# Pure-JAX f32 reference (unfolded BN, eval mode) — also validates the fold.
# -----------------------------------------------------------------------------
def reference_forward(x, params, eps=1e-5):
    def conv_bn_act(inp, w, b, gamma, beta, mean, var):
        # inp: (B, Lin, Cin); w: (Cout, Cin, K) PyTorch layout; padding=1.
        K = w.shape[2]
        Lout = inp.shape[1] + 2 - K + 1
        xp = jnp.pad(inp, ((0, 0), (1, 1), (0, 0)))
        y = sum(jnp.einsum("blc,oc->blo", xp[:, k:k + Lout, :], w[:, :, k])
                for k in range(K)) + b
        y = (y - mean) * (gamma / jnp.sqrt(var + eps)) + beta
        return jnp.where(y > 0, y, NEG_SLOPE * y)

    y = x
    for li in (1, 2, 3):
        y = conv_bn_act(y, params[f"conv{li}_w"], params[f"conv{li}_b"],
                        params[f"bn{li}_gamma"], params[f"bn{li}_beta"],
                        params[f"bn{li}_mean"], params[f"bn{li}_var"])
    feat = jnp.max(y, axis=1)                                  # (B, C)
    return feat @ params["fc_w"].T + params["fc_b"]


if __name__ == "__main__":
    B, L, E, NC = 2, 8, 100, 2   # batch, seq_len, embedding_dim=100, num_classes=2
    key = jax.random.PRNGKey(0)
    kx, kp = jax.random.split(key)
    x = jax.random.normal(kx, (B, L, E), jnp.float32)
    params = init_params(kp, E, NC)

    out = jax.block_until_ready(cnn_text_classifier_forward(x, params))
    ref = reference_forward(x, params)

    assert out.shape == (B, NC), out.shape
    assert bool(jnp.all(jnp.isfinite(out)))
    assert bool(jnp.allclose(out, ref, atol=5e-2, rtol=5e-2)), (out, ref)

    print("KERNEL_OK")
</pallas_src>

<mosaic_0001>
module attributes {stable_mosaic.version = 11 : i64} {
  func.func @_cnn_text_kernel(%arg0: i32, %arg1: memref<32x128xbf16, #tpu.memory_space<vmem>>, %arg2: memref<3x128x128xbf16, #tpu.memory_space<vmem>>, %arg3: memref<1x128xf32, #tpu.memory_space<vmem>>, %arg4: memref<512x128xbf16, #tpu.memory_space<vmem>>, %arg5: memref<1x128xf32, #tpu.memory_space<vmem>>, %arg6: memref<640x128xbf16, #tpu.memory_space<vmem>>, %arg7: memref<1x128xf32, #tpu.memory_space<vmem>>, %arg8: memref<128x128xbf16, #tpu.memory_space<vmem>>, %arg9: memref<1x128xf32, #tpu.memory_space<vmem>>, %arg10: memref<1x2x128xf32, #tpu.memory_space<vmem>>) attributes {dimension_semantics = [#tpu.dimension_semantics<parallel>], iteration_bounds = array<i64: 1>, scalar_prefetch = 0 : i64, scratch_operands = 0 : i64, tpu.core_type = #tpu.core_type<tc>, window_params = [{transform_indices = @transform_0, window_bounds = array<i64: 32, 128>}, {pipeline_mode = #tpu.pipeline_mode<synchronous>, transform_indices = @transform_1, window_bounds = array<i64: 3, 128, 128>}, {pipeline_mode = #tpu.pipeline_mode<synchronous>, transform_indices = @transform_2, window_bounds = array<i64: 1, 128>}, {pipeline_mode = #tpu.pipeline_mode<synchronous>, transform_indices = @transform_3, window_bounds = array<i64: 512, 128>}, {pipeline_mode = #tpu.pipeline_mode<synchronous>, transform_indices = @transform_4, window_bounds = array<i64: 1, 128>}, {pipeline_mode = #tpu.pipeline_mode<synchronous>, transform_indices = @transform_5, window_bounds = array<i64: 640, 128>}, {pipeline_mode = #tpu.pipeline_mode<synchronous>, transform_indices = @transform_6, window_bounds = array<i64: 1, 128>}, {pipeline_mode = #tpu.pipeline_mode<synchronous>, transform_indices = @transform_7, window_bounds = array<i64: 128, 128>}, {pipeline_mode = #tpu.pipeline_mode<synchronous>, transform_indices = @transform_8, window_bounds = array<i64: 1, 128>}, {transform_indices = @transform_9, window_bounds = array<i64: 1, 2, 128>}]} {
    %0 = tpu.iota {dimensions = array<i32: 0>} : vector<32x1xi32>
    %c16_i32 = arith.constant 16 : i32
    %c0_i32 = arith.constant 0 : i32
    %1 = arith.cmpi eq, %c16_i32, %c0_i32 : i32
    %c1_i32 = arith.constant 1 : i32
    %2 = arith.select %1, %c1_i32, %c16_i32 : i32
    %3 = vector.broadcast %2 : i32 to vector<32x1xi32>
    %4 = arith.remsi %0, %3 : vector<32x1xi32>
    %c0_i32_0 = arith.constant 0 : i32
    %5 = vector.broadcast %c0_i32_0 : i32 to vector<32x1xi32>
    %6 = arith.cmpi ne, %4, %5 : vector<32x1xi32>
    %c0_i32_1 = arith.constant 0 : i32
    %7 = vector.broadcast %c0_i32_1 : i32 to vector<32x1xi32>
    %8 = arith.cmpi slt, %4, %7 : vector<32x1xi32>
    %c0_i32_2 = arith.constant 0 : i32
    %9 = arith.cmpi slt, %2, %c0_i32_2 : i32
    %10 = vector.broadcast %9 : i1 to vector<32x1xi1>
    %11 = vector.broadcast %10 : vector<32x1xi1> to vector<32x1xi1>
    %12 = arith.xori %8, %11 : vector<32x1xi1>
    %13 = arith.andi %12, %6 : vector<32x1xi1>
    %14 = vector.broadcast %2 : i32 to vector<32x1xi32>
    %15 = arith.addi %4, %14 : vector<32x1xi32>
    %16 = arith.select %13, %15, %4 : vector<32x1xi1>, vector<32x1xi32>
    %c0 = arith.constant 0 : index
    %c0_3 = arith.constant 0 : index
    %17 = vector.load %arg1[%c0, %c0_3] : memref<32x128xbf16, #tpu.memory_space<vmem>>, vector<32x128xbf16>
    %c0_4 = arith.constant 0 : index
    %c0_5 = arith.constant 0 : index
    %c0_6 = arith.constant 0 : index
    %18 = vector.load %arg2[%c0_4, %c0_5, %c0_6] : memref<3x128x128xbf16, #tpu.memory_space<vmem>>, vector<1x128x128xbf16>
    %19 = vector.shape_cast %18 : vector<1x128x128xbf16> to vector<128x128xbf16>
    %cst = arith.constant dense<0.000000e+00> : vector<32x128xf32>
    %20 = tpu.matmul %17, %19, %cst {dimension_numbers = #tpu.dot_dimension_numbers<[1], [0], [0], [1], [0, 0, 1, 1], [], []>} : vector<32x128xbf16>, vector<128x128xbf16>, vector<32x128xf32> -> vector<32x128xf32>
    %c1 = arith.constant 1 : index
    %c0_7 = arith.constant 0 : index
    %c0_8 = arith.constant 0 : index
    %21 = vector.load %arg2[%c1, %c0_7, %c0_8] : memref<3x128x128xbf16, #tpu.memory_space<vmem>>, vector<1x128x128xbf16>
    %22 = vector.shape_cast %21 : vector<1x128x128xbf16> to vector<128x128xbf16>
    %cst_9 = arith.constant dense<0.000000e+00> : vector<32x128xf32>
    %23 = tpu.matmul %17, %22, %cst_9 {dimension_numbers = #tpu.dot_dimension_numbers<[1], [0], [0], [1], [0, 0, 1, 1], [], []>} : vector<32x128xbf16>, vector<128x128xbf16>, vector<32x128xf32> -> vector<32x128xf32>
    %c31_i32 = arith.constant 31 : i32
    %24 = tpu.dynamic_rotate %23 by %c31_i32 dim 0 : vector<32x128xf32>, i32 -> vector<32x128xf32>
    %25 = arith.addf %20, %24 : vector<32x128xf32>
    %c2 = arith.constant 2 : index
    %c0_10 = arith.constant 0 : index
    %c0_11 = arith.constant 0 : index
    %26 = vector.load %arg2[%c2, %c0_10, %c0_11] : memref<3x128x128xbf16, #tpu.memory_space<vmem>>, vector<1x128x128xbf16>
    %27 = vector.shape_cast %26 : vector<1x128x128xbf16> to vector<128x128xbf16>
    %cst_12 = arith.constant dense<0.000000e+00> : vector<32x128xf32>
    %28 = tpu.matmul %17, %27, %cst_12 {dimension_numbers = #tpu.dot_dimension_numbers<[1], [0], [0], [1], [0, 0, 1, 1], [], []>} : vector<32x128xbf16>, vector<128x128xbf16>, vector<32x128xf32> -> vector<32x128xf32>
    %c30_i32 = arith.constant 30 : i32
    %29 = tpu.dynamic_rotate %28 by %c30_i32 dim 0 : vector<32x128xf32>, i32 -> vector<32x128xf32>
    %30 = arith.addf %25, %29 : vector<32x128xf32>
    %c0_13 = arith.constant 0 : index
    %c0_14 = arith.constant 0 : index
    %31 = vector.load %arg3[%c0_13, %c0_14] : memref<1x128xf32, #tpu.memory_space<vmem>>, vector<1x128xf32>
    %32 = vector.broadcast %31 : vector<1x128xf32> to vector<32x128xf32>
    %33 = arith.addf %30, %32 : vector<32x128xf32>
    %cst_15 = arith.constant 0.00999999977 : f32
    %34 = vector.broadcast %cst_15 : f32 to vector<32x128xf32>
    %35 = arith.mulf %34, %33 : vector<32x128xf32>
    %36 = arith.maximumf %33, %35 : vector<32x128xf32>
    %c8_i32 = arith.constant 8 : i32
    %37 = vector.broadcast %c8_i32 : i32 to vector<32x1xi32>
    %38 = arith.cmpi slt, %16, %37 : vector<32x1xi32>
    %cst_16 = arith.constant 0.000000e+00 : f32
    %39 = vector.shape_cast %38 : vector<32x1xi1> to vector<32x1xi1>
    %40 = vector.broadcast %39 : vector<32x1xi1> to vector<32x128xi1>
    %41 = vector.broadcast %cst_16 : f32 to vector<32x128xf32>
    %42 = arith.select %40, %36, %41 : vector<32x128xi1>, vector<32x128xf32>
    %c1_i32_17 = arith.constant 1 : i32
    %43 = tpu.dynamic_rotate %42 by %c1_i32_17 dim 0 : vector<32x128xf32>, i32 -> vector<32x128xf32>
    %44 = arith.truncf %43 : vector<32x128xf32> to vector<32x128xbf16>
    %45 = arith.truncf %42 : vector<32x128xf32> to vector<32x128xbf16>
    %c31_i32_18 = arith.constant 31 : i32
    %46 = tpu.dynamic_rotate %42 by %c31_i32_18 dim 0 : vector<32x128xf32>, i32 -> vector<32x128xf32>
    %47 = arith.truncf %46 : vector<32x128xf32> to vector<32x128xbf16>
    %c30_i32_19 = arith.constant 30 : i32
    %48 = tpu.dynamic_rotate %42 by %c30_i32_19 dim 0 : vector<32x128xf32>, i32 -> vector<32x128xf32>
    %49 = arith.truncf %48 : vector<32x128xf32> to vector<32x128xbf16>
    %50 = tpu.concatenate %44, %45, %47, %49 in 1 : vector<32x128xbf16>, vector<32x128xbf16>, vector<32x128xbf16>, vector<32x128xbf16> -> vector<32x512xbf16>
    %c0_20 = arith.constant 0 : index
    %c0_21 = arith.constant 0 : index
    %51 = vector.load %arg4[%c0_20, %c0_21] : memref<512x128xbf16, #tpu.memory_space<vmem>>, vector<512x128xbf16>
    %cst_22 = arith.constant dense<0.000000e+00> : vector<32x128xf32>
    %52 = tpu.matmul %50, %51, %cst_22 {dimension_numbers = #tpu.dot_dimension_numbers<[1], [0], [0], [1], [0, 0, 1, 1], [], []>} : vector<32x512xbf16>, vector<512x128xbf16>, vector<32x128xf32> -> vector<32x128xf32>
    %c0_23 = arith.constant 0 : index
    %c0_24 = arith.constant 0 : index
    %53 = vector.load %arg5[%c0_23, %c0_24] : memref<1x128xf32, #tpu.memory_space<vmem>>, vector<1x128xf32>
    %54 = vector.broadcast %53 : vector<1x128xf32> to vector<32x128xf32>
    %55 = arith.addf %52, %54 : vector<32x128xf32>
    %cst_25 = arith.constant 0.00999999977 : f32
    %56 = vector.broadcast %cst_25 : f32 to vector<32x128xf32>
    %57 = arith.mulf %56, %55 : vector<32x128xf32>
    %58 = arith.maximumf %55, %57 : vector<32x128xf32>
    %c7_i32 = arith.constant 7 : i32
    %59 = vector.broadcast %c7_i32 : i32 to vector<32x1xi32>
    %60 = arith.cmpi slt, %16, %59 : vector<32x1xi32>
    %cst_26 = arith.constant 0.000000e+00 : f32
    %61 = vector.shape_cast %60 : vector<32x1xi1> to vector<32x1xi1>
    %62 = vector.broadcast %61 : vector<32x1xi1> to vector<32x128xi1>
    %63 = vector.broadcast %cst_26 : f32 to vector<32x128xf32>
    %64 = arith.select %62, %58, %63 : vector<32x128xi1>, vector<32x128xf32>
    %c1_i32_27 = arith.constant 1 : i32
    %65 = tpu.dynamic_rotate %64 by %c1_i32_27 dim 0 : vector<32x128xf32>, i32 -> vector<32x128xf32>
    %66 = arith.truncf %65 : vector<32x128xf32> to vector<32x128xbf16>
    %67 = arith.truncf %64 : vector<32x128xf32> to vector<32x128xbf16>
    %c31_i32_28 = arith.constant 31 : i32
    %68 = tpu.dynamic_rotate %64 by %c31_i32_28 dim 0 : vector<32x128xf32>, i32 -> vector<32x128xf32>
    %69 = arith.truncf %68 : vector<32x128xf32> to vector<32x128xbf16>
    %c30_i32_29 = arith.constant 30 : i32
    %70 = tpu.dynamic_rotate %64 by %c30_i32_29 dim 0 : vector<32x128xf32>, i32 -> vector<32x128xf32>
    %71 = arith.truncf %70 : vector<32x128xf32> to vector<32x128xbf16>
    %c29_i32 = arith.constant 29 : i32
    %72 = tpu.dynamic_rotate %64 by %c29_i32 dim 0 : vector<32x128xf32>, i32 -> vector<32x128xf32>
    %73 = arith.truncf %72 : vector<32x128xf32> to vector<32x128xbf16>
    %74 = tpu.concatenate %66, %67, %69, %71, %73 in 1 : vector<32x128xbf16>, vector<32x128xbf16>, vector<32x128xbf16>, vector<32x128xbf16>, vector<32x128xbf16> -> vector<32x640xbf16>
    %c0_30 = arith.constant 0 : index
    %c0_31 = arith.constant 0 : index
    %75 = vector.load %arg6[%c0_30, %c0_31] : memref<640x128xbf16, #tpu.memory_space<vmem>>, vector<640x128xbf16>
    %cst_32 = arith.constant dense<0.000000e+00> : vector<32x128xf32>
    %76 = tpu.matmul %74, %75, %cst_32 {dimension_numbers = #tpu.dot_dimension_numbers<[1], [0], [0], [1], [0, 0, 1, 1], [], []>} : vector<32x640xbf16>, vector<640x128xbf16>, vector<32x128xf32> -> vector<32x128xf32>
    %c0_33 = arith.constant 0 : index
    %c0_34 = arith.constant 0 : index
    %77 = vector.load %arg7[%c0_33, %c0_34] : memref<1x128xf32, #tpu.memory_space<vmem>>, vector<1x128xf32>
    %78 = vector.broadcast %77 : vector<1x128xf32> to vector<32x128xf32>
    %79 = arith.addf %76, %78 : vector<32x128xf32>
    %cst_35 = arith.constant 0.00999999977 : f32
    %80 = vector.broadcast %cst_35 : f32 to vector<32x128xf32>
    %81 = arith.mulf %80, %79 : vector<32x128xf32>
    %82 = arith.maximumf %79, %81 : vector<32x128xf32>
    %c5_i32 = arith.constant 5 : i32
    %83 = vector.broadcast %c5_i32 : i32 to vector<32x1xi32>
    %84 = arith.cmpi slt, %16, %83 : vector<32x1xi32>
    %cst_36 = arith.constant 0xFF800000 : f32
    %85 = vector.shape_cast %84 : vector<32x1xi1> to vector<32x1xi1>
    %86 = vector.broadcast %85 : vector<32x1xi1> to vector<32x128xi1>
    %87 = vector.broadcast %cst_36 : f32 to vector<32x128xf32>
    %88 = arith.select %86, %82, %87 : vector<32x128xi1>, vector<32x128xf32>
    %89 = vector.shape_cast %88 : vector<32x128xf32> to vector<2x16x128xf32>
    %cst_37 = arith.constant dense<0xFF800000> : vector<2x128xf32>
    %90 = vector.multi_reduction <maximumf>, %89, %cst_37 [1] : vector<2x16x128xf32> to vector<2x128xf32>
    %91 = arith.truncf %90 : vector<2x128xf32> to vector<2x128xbf16>
    %c0_38 = arith.constant 0 : index
    %c0_39 = arith.constant 0 : index
    %92 = vector.load %arg8[%c0_38, %c0_39] : memref<128x128xbf16, #tpu.memory_space<vmem>>, vector<128x128xbf16>
    %cst_40 = arith.constant dense<0.000000e+00> : vector<2x128xf32>
    %93 = tpu.matmul %91, %92, %cst_40 {dimension_numbers = #tpu.dot_dimension_numbers<[1], [0], [0], [1], [0, 0, 1, 1], [], []>} : vector<2x128xbf16>, vector<128x128xbf16>, vector<2x128xf32> -> vector<2x128xf32>
    %c0_41 = arith.constant 0 : index
    %c0_42 = arith.constant 0 : index
    %94 = vector.load %arg9[%c0_41, %c0_42] : memref<1x128xf32, #tpu.memory_space<vmem>>, vector<1x128xf32>
    %95 = vector.broadcast %94 : vector<1x128xf32> to vector<2x128xf32>
    %96 = arith.addf %93, %95 : vector<2x128xf32>
    %c0_43 = arith.constant 0 : index
    %c0_44 = arith.constant 0 : index
    %c0_45 = arith.constant 0 : index
    %97 = vector.load %arg10[%c0_43, %c0_44, %c0_45] : memref<1x2x128xf32, #tpu.memory_space<vmem>>, vector<1x2x128xf32>
    %98 = vector.shape_cast %97 : vector<1x2x128xf32> to vector<2x128xf32>
    %99 = vector.shape_cast %96 : vector<2x128xf32> to vector<1x2x128xf32>
    tpu.vector_store %arg10[%c0_43, %c0_44, %c0_45], %99 {strides = array<i32>} : memref<1x2x128xf32, #tpu.memory_space<vmem>>, vector<1x2x128xf32>,
    return
  }
  func.func @transform_0(%arg0: i32) -> (i32, i32) {
    %c0_i32 = arith.constant 0 : i32
    %c0_i32_0 = arith.constant 0 : i32
    return %arg0, %c0_i32 : i32, i32
  }
  func.func @transform_1(%arg0: i32) -> (i32, i32, i32) {
    %c0_i32 = arith.constant 0 : i32
    %c0_i32_0 = arith.constant 0 : i32
    %c0_i32_1 = arith.constant 0 : i32
    %c0_i32_2 = arith.constant 0 : i32
    return %c0_i32, %c0_i32_0, %c0_i32_1 : i32, i32, i32
  }
  func.func @transform_2(%arg0: i32) -> (i32, i32) {
    %c0_i32 = arith.constant 0 : i32
    %c0_i32_0 = arith.constant 0 : i32
    %c0_i32_1 = arith.constant 0 : i32
    return %c0_i32, %c0_i32_0 : i32, i32
  }
  func.func @transform_3(%arg0: i32) -> (i32, i32) {
    %c0_i32 = arith.constant 0 : i32
    %c0_i32_0 = arith.constant 0 : i32
    %c0_i32_1 = arith.constant 0 : i32
    return %c0_i32, %c0_i32_0 : i32, i32
  }
  func.func @transform_4(%arg0: i32) -> (i32, i32) {
    %c0_i32 = arith.constant 0 : i32
    %c0_i32_0 = arith.constant 0 : i32
    %c0_i32_1 = arith.constant 0 : i32
    return %c0_i32, %c0_i32_0 : i32, i32
  }
  func.func @transform_5(%arg0: i32) -> (i32, i32) {
    %c0_i32 = arith.constant 0 : i32
    %c0_i32_0 = arith.constant 0 : i32
    %c0_i32_1 = arith.constant 0 : i32
    return %c0_i32, %c0_i32_0 : i32, i32
  }
  func.func @transform_6(%arg0: i32) -> (i32, i32) {
    %c0_i32 = arith.constant 0 : i32
    %c0_i32_0 = arith.constant 0 : i32
    %c0_i32_1 = arith.constant 0 : i32
    return %c0_i32, %c0_i32_0 : i32, i32
  }
  func.func @transform_7(%arg0: i32) -> (i32, i32) {
    %c0_i32 = arith.constant 0 : i32
    %c0_i32_0 = arith.constant 0 : i32
    %c0_i32_1 = arith.constant 0 : i32
    return %c0_i32, %c0_i32_0 : i32, i32
  }
  func.func @transform_8(%arg0: i32) -> (i32, i32) {
    %c0_i32 = arith.constant 0 : i32
    %c0_i32_0 = arith.constant 0 : i32
    %c0_i32_1 = arith.constant 0 : i32
    return %c0_i32, %c0_i32_0 : i32, i32
  }
  func.func @transform_9(%arg0: i32) -> (i32, i32, i32) {
    %c0_i32 = arith.constant 0 : i32
    %c0_i32_0 = arith.constant 0 : i32
    %c0_i32_1 = arith.constant 0 : i32
    return %arg0, %c0_i32, %c0_i32_0 : i32, i32, i32
  }
}

</mosaic_0001>

<bundles_post_ra>
// kernel: cnn_text_classifier_forward.1
= control target key start
LH: loop header
LB: loop body
LE: loop exit
PB: predicated region body
PF: predicated region fallthrough
CT: control target
= control target key end

     0   :  { %s2653_s0 = inlined_call_operand.vmem [shape: bf16[32,128], index: 0, kind: input, shape index: {}]   ;;  %s2654_s1 = inlined_call_operand.vmem [shape: bf16[3,128,128], index: 1, kind: input, shape index: {}]   ;;  %s2655_s2 = inlined_call_operand.vmem [shape: f32[1,128], index: 2, kind: input, shape index: {}]   ;;  %s2656_s3 = inlined_call_operand.vmem [shape: bf16[512,128], index: 3, kind: input, shape index: {}]   ;;  %s2657_s4 = inlined_call_operand.vmem [shape: f32[1,128], index: 4, kind: input, shape index: {}]   ;;  %s2658_s5 = inlined_call_operand.vmem [shape: bf16[640,128], index: 5, kind: input, shape index: {}]   ;;  %s2659_s6 = inlined_call_operand.vmem [shape: f32[1,128], index: 6, kind: input, shape index: {}]   ;;  %s2660_s7 = inlined_call_operand.vmem [shape: bf16[128,128], index: 7, kind: input, shape index: {}]   ;;  %s2661_s8 = inlined_call_operand.vmem [shape: f32[1,128], index: 8, kind: input, shape index: {}]   ;;  %s2662_s9 = inlined_call_operand.hbm [shape: f32[1,2,128], index: 9, kind: output, shape index: {}]  }
   0x1   :  { %v2007_v0 = vld [vmem:[%s2654_s1 + $0x78] sm:$0xff]  ;;  %v2006_v3 = vld [vmem:[%s2654_s1 + $0x70] sm:$0xff]  ;;  %v2005_v6 = vld [vmem:[%s2654_s1 + $0x68] sm:$0xff] }
   0x2   :  { %v2015_v1 = vld [vmem:[%s2654_s1 + $0xb8] sm:$0xff]  ;;  %183 = vmatpush.bf16.msra.mxu0 %v2007_v0  ;;  %v2014_v4 = vld [vmem:[%s2654_s1 + $0xb0] sm:$0xff]  ;;  %v2013_v7 = vld [vmem:[%s2654_s1 + $0xa8] sm:$0xff] }
   0x3   :  { %v1999_v2 = vld [vmem:[%s2654_s1 + $0x38] sm:$0xff]  ;;  %343 = vmatpush.bf16.msra.mxu2 %v2015_v1  ;;  %v1998_v5 = vld [vmem:[%s2654_s1 + $0x30] sm:$0xff]  ;;  %v1997_v8 = vld [vmem:[%s2654_s1 + $0x28] sm:$0xff] }
   0x4   :  { %259 = vmatpush.bf16.msra.mxu1 %v1999_v2  ;;  %v2004_v9 = vld [vmem:[%s2654_s1 + $0x60] sm:$0xff] }
   0x5   :  { %v2012_v10 = vld [vmem:[%s2654_s1 + $0xa0] sm:$0xff] }
   0x6   :  { %184 = vmatpush.bf16.msra.mxu0 %v2006_v3 }
   0x7   :  { %344 = vmatpush.bf16.msra.mxu2 %v2014_v4 }
   0x8   :  { %260 = vmatpush.bf16.msra.mxu1 %v1998_v5 }
   0xa   :  { %185 = vmatpush.bf16.msra.mxu0 %v2005_v6 }
   0xb   :  { %345 = vmatpush.bf16.msra.mxu2 %v2013_v7 }
   0xc   :  { %14 = vsyncpa [#allocation3], 0  ;;  %261 = vmatpush.bf16.msra.mxu1 %v1997_v8  ;;  %v1996_v11 = vld [vmem:[%s2654_s1 + $0x20] sm:$0xff]  ;;  %v2003_v12 = vld [vmem:[%s2654_s1 + $0x58] sm:$0xff]  ;;  %v33_v52 = vlaneseq  ;;  %vm1452_vm8 = vcmask 1041409   ;;  %s2131_s13 = smov [#allocation2]  }
   0xd   :  { %v2011_v13 = vld [vmem:[%s2654_s1 + $0x98] sm:$0xff]  ;;  %v2002_v15 = vld [vmem:[%s2654_s1 + $0x50] sm:$0xff]  ;;  %v2001_v18 = vld [vmem:[%s2654_s1 + $0x48] sm:$0xff]  ;;  %s1523_s14 = sshll.u32 %s2131_s13, 4  ;;  %s1524_s14 = int_to_ptr.vmem [resolvable:$true] %s1523_s14 }
   0xe   :  { %186 = vmatpush.bf16.msra.mxu0 %v2004_v9  ;;  %v1995_v14 = vld [vmem:[%s2654_s1 + $0x18] sm:$0xff]  ;;  %v2010_v16 = vld [vmem:[%s2654_s1 + $0x90] sm:$0xff]  ;;  %v2009_v19 = vld [vmem:[%s2654_s1 + $0x88] sm:$0xff]  ;;  %v2338_v56 = vshrl.u32 %v33_v52, 7 }
   0xf   :  { %346 = vmatpush.bf16.msra.mxu2 %v2012_v10  ;;  %v1994_v17 = vld [vmem:[%s2654_s1 + $0x10] sm:$0xff]  ;;  %v1993_v20 = vld [vmem:[%s2654_s1 + $0x8] sm:$0xff]  ;;  %v2000_v21 = vld [vmem:[%s2654_s1 + $0x40] sm:$0xff] }
  0x10   :  { %262 = vmatpush.bf16.msra.mxu1 %v1996_v11  ;;  %v2008_v22 = vld [vmem:[%s2654_s1 + $0x80] sm:$0xff]  ;;  %v1991_v25 = vld [vmem:[%s2653_s0 + $0x8] sm:$0xff]  ;;  %v2031_v26 = vld [vmem:[%s2656_s3 + $0x78] sm:$0xff]  ;;  %vm206_vm0 = vcmp.lt.s32.totalorder %v2338_v56, 7  ;;  %vm366_vm1 = vcmp.lt.s32.totalorder %v2338_v56, 6  ;;  %vm411_vm2 = vcmp.lt.s32.totalorder %v2338_v56, 1 }
  0x11   :  { %v1992_v23 = vld [vmem:[%s2654_s1] sm:$0xff]  ;;  %v2023_v27 = vld [vmem:[%s2656_s3 + $0x38] sm:$0xff]  ;;  %v2030_v28 = vld [vmem:[%s2656_s3 + $0x70] sm:$0xff]  ;;  %vm900_vm5 = vcmp.lt.s32.totalorder %v2338_v56, 5 }
  0x12   :  { %187 = vmatpush.bf16.msra.mxu0 %v2003_v12  ;;  %v1990_v24 = vld [vmem:[%s2653_s0] sm:$0xff]  ;;  %756 = vmatpush.bf16.msra.mxu3 %v2023_v27  ;;  %v2022_v29 = vld [vmem:[%s2656_s3 + $0x30] sm:$0xff]  ;;  %v2029_v30 = vld [vmem:[%s2656_s3 + $0x68] sm:$0xff] }
  0x13   :  { %347 = vmatpush.bf16.msra.mxu2 %v2011_v13  ;;  %v2021_v31 = vld [vmem:[%s2656_s3 + $0x28] sm:$0xff]  ;;  %v2028_v32 = vld [vmem:[%s2656_s3 + $0x60] sm:$0xff]  ;;  %v2027_v34 = vld [vmem:[%s2656_s3 + $0x58] sm:$0xff] }
  0x14   :  { %263 = vmatpush.bf16.msra.mxu1 %v1995_v14  ;;  %v2020_v33 = vld [vmem:[%s2656_s3 + $0x20] sm:$0xff]  ;;  %v2047_v35 = vld [vmem:[%s2656_s3 + $0xf8] sm:$0xff]  ;;  %v2026_v38 = vld [vmem:[%s2656_s3 + $0x50] sm:$0xff] }
  0x15   :  { %v2019_v36 = vld [vmem:[%s2656_s3 + $0x18] sm:$0xff]  ;;  %v2046_v39 = vld [vmem:[%s2656_s3 + $0xf0] sm:$0xff]  ;;  %v2025_v42 = vld [vmem:[%s2656_s3 + $0x48] sm:$0xff] }
  0x16   :  { %188 = vmatpush.bf16.msra.mxu0 %v2002_v15  ;;  %757 = vmatpush.bf16.msra.mxu3 %v2022_v29  ;;  %v2039_v37 = vld [vmem:[%s2656_s3 + $0xb8] sm:$0xff]  ;;  %v2018_v40 = vld [vmem:[%s2656_s3 + $0x10] sm:$0xff]  ;;  %v2045_v43 = vld [vmem:[%s2656_s3 + $0xe8] sm:$0xff] }
  0x17   :  { %348 = vmatpush.bf16.msra.mxu2 %v2010_v16  ;;  %v2038_v41 = vld [vmem:[%s2656_s3 + $0xb0] sm:$0xff]  ;;  %v2017_v44 = vld [vmem:[%s2656_s3 + $0x8] sm:$0xff]  ;;  %v2024_v46 = vld [vmem:[%s2656_s3 + $0x40] sm:$0xff] }
  0x18   :  { %264 = vmatpush.bf16.msra.mxu1 %v1994_v17  ;;  %v2037_v45 = vld [vmem:[%s2656_s3 + $0xa8] sm:$0xff]  ;;  %v2044_v47 = vld [vmem:[%s2656_s3 + $0xe0] sm:$0xff]  ;;  %v2043_v53 = vld [vmem:[%s2656_s3 + $0xd8] sm:$0xff] }
  0x19   :  { %v2016_v48 = vld [vmem:[%s2656_s3] sm:$0xff]  ;;  %v2035_v54 = vld [vmem:[%s2656_s3 + $0x98] sm:$0xff]  ;;  %v2042_v57 = vld [vmem:[%s2656_s3 + $0xd0] sm:$0xff] }
  0x1a   :  { %189 = vmatpush.bf16.msra.mxu0 %v2001_v18  ;;  %758 = vmatpush.bf16.msra.mxu3 %v2021_v31  ;;  %v2036_v49 = vld [vmem:[%s2656_s3 + $0xa0] sm:$0xff]  ;;  %v2034_v58 = vld [vmem:[%s2656_s3 + $0x90] sm:$0xff]  ;;  %v2041_v60 = vld [vmem:[%s2656_s3 + $0xc8] sm:$0xff]  ;;  %v2129_v18 = vmov 0.0  }
  0x1b   :  { %349 = vmatpush.bf16.msra.mxu2 %v2009_v19  ;;  %v2033_v63 = vld [vmem:[%s2656_s3 + $0x88] sm:$0xff]  ;;  %v2040_v1 = vld [vmem:[%s2656_s3 + $0xc0] sm:$0xff]  ;;  %v2370_v19 = vrot.slane %v2129_v18, 7 }
  0x1c   :  { %265 = vmatpush.bf16.msra.mxu1 %v1993_v20  ;;  %v2032_v4 = vld [vmem:[%s2656_s3 + $0x80] sm:$0xff]  ;;  %s1525_s3 = sshll.u32 %s2662_s9, 4  ;;  %s1526_s3 = int_to_ptr.hbm [resolvable:$true] %s1525_s3 }
  0x1d   :  { %v2099_v8 = vld [vmem:[%s2655_s2] ss:$0 sm:$0xff] }
  0x1e   :  { %190 = vmatpush.bf16.msra.mxu0 %v2000_v21  ;;  %759 = vmatpush.bf16.msra.mxu3 %v2020_v33 }
  0x1f   :  { %350 = vmatpush.bf16.msra.mxu2 %v2008_v22 }
  0x20   :  { %266 = vmatpush.bf16.msra.mxu1 %v1992_v23  ;;  %v2130_v23 = vmov 0.0|0.0  }
  0x21   :  { %191 = vmatmul.bf16.vlgmr.msra.gmra.mxu0 %v1990_v24 }
  0x22   :  { %351 = vmatmul.bf16.vlgmr.msra.gmra.mxu2 %v1990_v24  ;;  %775 = vmatpush.bf16.msrb.mxu0 %v2031_v26 }
  0x23   :  { %267 = vmatmul.bf16.vlgmr.msra.gmra.mxu1 %v1990_v24  ;;  %813 = vmatpush.bf16.msrb.mxu2 %v2047_v35  ;;  %v2375_v24 = vunpack.c.l.b16 %v2130_v23 }
  0x24   :  { %760 = vmatpush.bf16.msra.mxu3 %v2019_v36  ;;  %794 = vmatpush.bf16.msrb.mxu1 %v2039_v37 }
  0x26   :  { %776 = vmatpush.bf16.msrb.mxu0 %v2030_v28 }
  0x27   :  { %814 = vmatpush.bf16.msrb.mxu2 %v2046_v39 }
  0x28   :  { %761 = vmatpush.bf16.msra.mxu3 %v2018_v40  ;;  %795 = vmatpush.bf16.msrb.mxu1 %v2038_v41 }
  0x2a   :  { %777 = vmatpush.bf16.msrb.mxu0 %v2029_v30 }
  0x2b   :  { %815 = vmatpush.bf16.msrb.mxu2 %v2045_v43  ;;  %v2390_v43 = vrot.slane %v2129_v18, 1 }
  0x2c   :  { %762 = vmatpush.bf16.msra.mxu3 %v2017_v44  ;;  %796 = vmatpush.bf16.msrb.mxu1 %v2037_v45 }
  0x2e   :  { %778 = vmatpush.bf16.msrb.mxu0 %v2028_v32 }
  0x2f   :  { %816 = vmatpush.bf16.msrb.mxu2 %v2044_v47  ;;  %v2395_v47 = vrot.slane %v2129_v18, 2 }
  0x30   :  { %763 = vmatpush.bf16.msra.mxu3 %v2016_v48  ;;  %797 = vmatpush.bf16.msrb.mxu1 %v2036_v49 }
  0x31   :  { %196 = vmatmul.bf16.gmra.mxu0 %v1991_v25 }
  0x32   :  { %356 = vmatmul.bf16.gmra.mxu2 %v1991_v25  ;;  %779 = vmatpush.bf16.msrb.mxu0 %v2027_v34 }
  0x33   :  { %272 = vmatmul.bf16.gmra.mxu1 %v1991_v25  ;;  %817 = vmatpush.bf16.msrb.mxu2 %v2043_v53 }
  0x34   :  { %798 = vmatpush.bf16.msrb.mxu1 %v2035_v54 }
  0x36   :  { %780 = vmatpush.bf16.msrb.mxu0 %v2026_v38 }
  0x37   :  { %818 = vmatpush.bf16.msrb.mxu2 %v2042_v57 }
  0x38   :  { %799 = vmatpush.bf16.msrb.mxu1 %v2034_v58 }
  0x3a   :  { %781 = vmatpush.bf16.msrb.mxu0 %v2025_v42 }
  0x3b   :  { %819 = vmatpush.bf16.msrb.mxu2 %v2041_v60 }
  0x3c   :  { %800 = vmatpush.bf16.msrb.mxu1 %v2033_v63 }
  0x3e   :  { %782 = vmatpush.bf16.msrb.mxu0 %v2024_v46 }
  0x3f   :  { %820 = vmatpush.bf16.msrb.mxu2 %v2040_v1 }
  0x40   :  { %801 = vmatpush.bf16.msrb.mxu1 %v2032_v4 }
  0x9e   :  { %v192_v50 = vpop.f32.mrf.mxu0 }
  0x9f   :  { %v202_v0 = vrot.slane %v192_v50, 1 }
  0xa0   :  { %v268_v51 = vpop.f32.mrf.mxu1 }
  0xa5   :  { %v352_v55 = vpop.f32.mrf.mxu2 }
  0xa6   :  { %v194_v59 = vpop.f32.mrf.mxu0  ;;  %v362_v5 = vrot.slane %v352_v55, 2 }
  0xa7   :  { %v203_v61 = vrot.slane %v194_v59, 1 }
  0xa8   :  { %v270_v62 = vpop.f32.mrf.mxu1 }
  0xa9   :  { %v209_v2 = vsel %vm206_vm0, %v202_v0, %v203_v61 }
  0xaa   :  { %v269_v7 = vadd.f32 %v268_v51, %v209_v2 }
  0xad   :  { %v354_v3 = vpop.f32.mrf.mxu2 }
  0xae   :  { %v363_v6 = vrot.slane %v354_v3, 2  ;;  %v197_v9 = vpop.f32.mrf.mxu0 }
  0xaf   :  { %v204_v26 = vrot.slane %v197_v9, 1 }
  0xb0   :  { %v369_v10 = vsel %vm366_vm1, %v362_v5, %v363_v6  ;;  %v273_v11 = vpop.f32.mrf.mxu1 }
  0xb1   :  { %v371_v12 = vadd.f32 %v369_v10, %v269_v7 }
  0xb3   :  { %v379_v13 = vadd.f32 %v2099_v8, %v371_v12 }
  0xb5   :  { %v383_v14 = vmul.f32 0.01, %v379_v13  ;;  %v357_v15 = vpop.f32.mrf.mxu2 }
  0xb6   :  { %v199_v17 = vpop.f32.mrf.mxu0  ;;  %v364_v35 = vrot.slane %v357_v15, 2 }
  0xb7   :  { %v2367_v16 = vmax.f32 %v379_v13, %v383_v14  ;;  %v205_v20 = vrot.slane %v199_v17, 1 }
  0xb8   :  { %v275_v21 = vpop.f32.mrf.mxu1 }
  0xb9   :  { %v420_v22 = vpack.c.bf16 %v2367_v16, %v2367_v16  ;;  %v407_v25 = vrot.slane %v2367_v16, 7  ;;  %v207_v30 = vsel %vm206_vm0, %v204_v26, %v205_v20  ;;  %v424_v45 = vrot.slane %v2367_v16, 1 }
  0xba   :  { %v274_v39 = vadd.f32 %v273_v11, %v207_v30  ;;  %v436_v46 = vrot.slane %v2367_v16, 2 }
  0xbb   :  { %v464_v27 = vunpack.c.l.b16 %v420_v22  ;;  %v414_v28 = vsel %vm411_vm2, %v407_v25, %v2370_v19  ;;  %v415_v29 = vsel %vm411_vm2, %v2370_v19, %v407_v25  ;;  %v430_v50 = vsel %vm206_vm0, %v424_v45, %v2390_v43 }
  0xbc   :  { %v416_v31 = vpack.c.bf16 %v415_v29, %v415_v29  ;;  %v417_v32 = vpack.c.bf16 %v414_v28, %v414_v28  ;;  %v442_v51 = vsel %vm366_vm1, %v436_v46, %v2395_v47  ;;  %v432_v57 = vpack.c.bf16 %v430_v50, %v430_v50  ;;  %v2057_v50 = vld [vmem:[%s2658_s5 + $0x48] sm:$0xff] }
  0xbd   :  { %v359_v33 = vpop.f32.mrf.mxu2  ;;  %v468_v34 = vpack.c.b16 %v2375_v24, %v464_v27  ;;  %v444_v58 = vpack.c.bf16 %v442_v51, %v442_v51  ;;  %v431_v16 = vsel %vm206_vm0, %v2390_v43, %v424_v45  ;;  %v443_v20 = vsel %vm366_vm1, %v2395_v47, %v436_v46  ;;  %v2050_v46 = vld [vmem:[%s2658_s5 + $0x10] sm:$0xff]  ;;  %v2049_v51 = vld [vmem:[%s2658_s5 + $0x8] sm:$0xff] }
  0xbe   :  { %v365_v36 = vrot.slane %v359_v33, 2  ;;  %v452_v37 = vunpack.c.l.b16 %v416_v31  ;;  %v453_v38 = vunpack.c.l.b16 %v417_v32  ;;  %v476_v7 = vunpack.c.l.b16 %v432_v57  ;;  %v2063_v31 = vld [vmem:[%s2658_s5 + $0x78] sm:$0xff]  ;;  %v2062_v33 = vld [vmem:[%s2658_s5 + $0x70] sm:$0xff] }
  0xbf   :  { %783 = vmatmul.bf16.vlgmr.msrb.gmra.mxu0 %v468_v34  ;;  %v488_v9 = vunpack.c.l.b16 %v444_v58  ;;  %v435_v22 = vpack.c.bf16 %v431_v16, %v431_v16  ;;  %v447_v23 = vpack.c.bf16 %v443_v20, %v443_v20  ;;  %v2055_v32 = vld [vmem:[%s2658_s5 + $0x38] sm:$0xff]  ;;  %v2054_v34 = vld [vmem:[%s2658_s5 + $0x30] sm:$0xff]  ;;  %v2064_v16 = vld [vmem:[%s2658_s5 + $0x80] sm:$0xff]  ;;  %v42_v20 = vand.u32 15, %v2338_v56 }
  0xc0   :  { %v367_v40 = vsel %vm366_vm1, %v364_v35, %v365_v36  ;;  %v456_v41 = vpack.c.b16 %v453_v38, %v452_v37  ;;  %1312 = vmatpush.bf16.msra.mxu0 %v2063_v31  ;;  %1293 = vmatpush.bf16.msrb.mxu3 %v2055_v32  ;;  %v2061_v35 = vld [vmem:[%s2658_s5 + $0x68] sm:$0xff]  ;;  %v2060_v37 = vld [vmem:[%s2658_s5 + $0x60] sm:$0xff] }
  0xc1   :  { %v373_v42 = vadd.f32 %v367_v40, %v274_v39  ;;  %v479_v27 = vunpack.c.l.b16 %v435_v22  ;;  %v491_v28 = vunpack.c.l.b16 %v447_v23  ;;  %v2053_v36 = vld [vmem:[%s2658_s5 + $0x28] sm:$0xff]  ;;  %v2052_v38 = vld [vmem:[%s2658_s5 + $0x20] sm:$0xff]  ;;  %v2059_v39 = vld [vmem:[%s2658_s5 + $0x58] sm:$0xff]  ;;  %vm840_vm3 = vcmp.lt.s32.totalorder %v42_v20, 7 }
  0xc2   :  { %764 = vmatmul.bf16.vlgmr.msra.gmra.mxu3 %v456_v41  ;;  %v2051_v40 = vld [vmem:[%s2658_s5 + $0x18] sm:$0xff]  ;;  %vm1396_vm6 = vcmp.lt.s32.totalorder %v42_v20, 5 }
  0xc3   :  { %v381_v44 = vadd.f32 %v2099_v8, %v373_v42  ;;  %v2071_v41 = vld [vmem:[%s2658_s5 + $0xb8] sm:$0xff] }
  0xc4   :  { %1313 = vmatpush.bf16.msra.mxu0 %v2062_v33  ;;  %1294 = vmatpush.bf16.msrb.mxu3 %v2054_v34  ;;  %v2079_v42 = vld [vmem:[%s2658_s5 + $0xf8] sm:$0xff] }
  0xc5   :  { %v385_v48 = vmul.f32 0.01, %v381_v44  ;;  %1331 = vmatpush.bf16.msra.mxu1 %v2071_v41  ;;  %1350 = vmatpush.bf16.msra.mxu2 %v2079_v42  ;;  %v2563_v42 = vadd.s32 16, %v2338_v56 }
  0xc7   :  { %v389_v49 = vmax.f32 %v381_v44, %v385_v48  ;;  %v2058_v44 = vld [vmem:[%s2658_s5 + $0x50] sm:$0xff] }
  0xc8   :  { %1314 = vmatpush.bf16.msra.mxu0 %v2061_v35  ;;  %1295 = vmatpush.bf16.msrb.mxu3 %v2053_v36  ;;  %v2070_v48 = vld [vmem:[%s2658_s5 + $0xb0] sm:$0xff]  ;;  %v2081_v36 = vld [vmem:[%s2658_s5 + $0x108] sm:$0xff] }
  0xc9   :  { %v422_v52 = vpack.c.bf16 %v389_v49, %v389_v49  ;;  %v409_v53 = vrot.slane %v389_v49, 7  ;;  %v426_v54 = vrot.slane %v389_v49, 1  ;;  %v438_v55 = vrot.slane %v389_v49, 2  ;;  %v2078_v49 = vld [vmem:[%s2658_s5 + $0xf0] sm:$0xff]  ;;  %1332 = vmatpush.bf16.msra.mxu1 %v2070_v48 }
  0xca   :  { %1351 = vmatpush.bf16.msra.mxu2 %v2078_v49  ;;  %v2080_v49 = vld [vmem:[%s2658_s5 + $0x100] sm:$0xff] }
  0xcb   :  { %v466_v59 = vunpack.c.l.b16 %v422_v52  ;;  %v412_v60 = vsel %vm411_vm2, %v409_v53, %v2370_v19  ;;  %v413_v61 = vsel %vm411_vm2, %v2370_v19, %v409_v53  ;;  %v429_v62 = vsel %vm206_vm0, %v2390_v43, %v426_v54  ;;  %v2069_v52 = vld [vmem:[%s2658_s5 + $0xa8] sm:$0xff] }
  0xcc   :  { %v418_v63 = vpack.c.bf16 %v413_v61, %v413_v61  ;;  %v419_v0 = vpack.c.bf16 %v412_v60, %v412_v60  ;;  %v433_v1 = vpack.c.bf16 %v429_v62, %v429_v62  ;;  %v441_v2 = vsel %vm366_vm1, %v2395_v47, %v438_v55  ;;  %1315 = vmatpush.bf16.msra.mxu0 %v2060_v37  ;;  %v2077_v53 = vld [vmem:[%s2658_s5 + $0xe8] sm:$0xff]  ;;  %v2076_v60 = vld [vmem:[%s2658_s5 + $0xe0] sm:$0xff]  ;;  %v2087_v61 = vld [vmem:[%s2658_s5 + $0x138] sm:$0xff] }
  0xcd   :  { %v469_v3 = vpack.c.b16 %v2375_v24, %v466_v59  ;;  %v445_v4 = vpack.c.bf16 %v441_v2, %v441_v2  ;;  %v428_v14 = vsel %vm206_vm0, %v426_v54, %v2390_v43  ;;  %v440_v15 = vsel %vm366_vm1, %v438_v55, %v2395_v47  ;;  %1296 = vmatpush.bf16.msrb.mxu3 %v2052_v38  ;;  %v2056_v54 = vld [vmem:[%s2658_s5 + $0x40] sm:$0xff]  ;;  %v2067_v62 = vld [vmem:[%s2658_s5 + $0x98] sm:$0xff] }
  0xce   :  { %v454_v5 = vunpack.c.l.b16 %v418_v63  ;;  %v455_v6 = vunpack.c.l.b16 %v419_v0  ;;  %v477_v8 = vunpack.c.l.b16 %v433_v1  ;;  %v434_v17 = vpack.c.bf16 %v428_v14, %v428_v14  ;;  %1333 = vmatpush.bf16.msra.mxu1 %v2069_v52  ;;  %v2048_v55 = vld [vmem:[%s2658_s5] sm:$0xff]  ;;  %1352 = vmatpush.bf16.msra.mxu2 %v2077_v53  ;;  %v2075_v63 = vld [vmem:[%s2658_s5 + $0xd8] sm:$0xff] }
  0xcf   :  { %788 = vmatmul.bf16.gmra.mxu0 %v469_v3  ;;  %v489_v10 = vunpack.c.l.b16 %v445_v4  ;;  %v446_v21 = vpack.c.bf16 %v440_v15, %v440_v15  ;;  %v2068_v59 = vld [vmem:[%s2658_s5 + $0xa0] sm:$0xff]  ;;  %v2086_v3 = vld [vmem:[%s2658_s5 + $0x130] sm:$0xff]  ;;  %v56_v52 = vand.u32 15, %v2563_v42 }
  0xd0   :  { %v457_v11 = vpack.c.b16 %v455_v6, %v454_v5  ;;  %v480_v12 = vpack.c.b16 %v477_v8, %v476_v7  ;;  %v478_v25 = vunpack.c.l.b16 %v434_v17  ;;  %1316 = vmatpush.bf16.msra.mxu0 %v2059_v39  ;;  %v2100_v0 = vld [vmem:[%s2657_s4] ss:$0 sm:$0xff]  ;;  %v2066_v4 = vld [vmem:[%s2658_s5 + $0x90] sm:$0xff]  ;;  %v2085_v8 = vld [vmem:[%s2658_s5 + $0x128] sm:$0xff] }
  0xd1   :  { %v492_v13 = vpack.c.b16 %v489_v10, %v488_v9  ;;  %v490_v26 = vunpack.c.l.b16 %v446_v21  ;;  %1297 = vmatpush.bf16.msrb.mxu3 %v2051_v40  ;;  %v2074_v5 = vld [vmem:[%s2658_s5 + $0xd0] sm:$0xff]  ;;  %v2065_v9 = vld [vmem:[%s2658_s5 + $0x88] sm:$0xff]  ;;  %v2072_v17 = vld [vmem:[%s2658_s5 + $0xc0] sm:$0xff]  ;;  %vm842_vm4 = vcmp.lt.s32.totalorder %v56_v52, 7  ;;  %vm1398_vm7 = vcmp.lt.s32.totalorder %v56_v52, 5 }
  0xd2   :  { %769 = vmatmul.bf16.gmra.mxu3 %v457_v11  ;;  %802 = vmatmul.bf16.vlgmr.msrb.gmra.mxu1 %v480_v12  ;;  %v481_v29 = vpack.c.b16 %v479_v27, %v478_v25  ;;  %v2073_v10 = vld [vmem:[%s2658_s5 + $0xc8] sm:$0xff]  ;;  %v2084_v12 = vld [vmem:[%s2658_s5 + $0x120] sm:$0xff]  ;;  %v2083_v25 = vld [vmem:[%s2658_s5 + $0x118] sm:$0xff] }
  0xd3   :  { %821 = vmatmul.bf16.vlgmr.msrb.gmra.mxu2 %v492_v13  ;;  %v493_v30 = vpack.c.b16 %v491_v28, %v490_v26  ;;  %1334 = vmatpush.bf16.msra.mxu1 %v2068_v59  ;;  %v2082_v28 = vld [vmem:[%s2658_s5 + $0x110] sm:$0xff]  ;;  %v2102_v52 = vld [vmem:[%s2661_s8] ss:$0 sm:$0xff] }
  0xd4   :  { %1317 = vmatpush.bf16.msra.mxu0 %v2058_v44  ;;  %1353 = vmatpush.bf16.msra.mxu2 %v2076_v60 }
  0xd5   :  { %1298 = vmatpush.bf16.msrb.mxu3 %v2050_v46 }
  0xd7   :  { %1335 = vmatpush.bf16.msra.mxu1 %v2067_v62 }
  0xd8   :  { %1318 = vmatpush.bf16.msra.mxu0 %v2057_v50  ;;  %1354 = vmatpush.bf16.msra.mxu2 %v2075_v63 }
  0xd9   :  { %1299 = vmatpush.bf16.msrb.mxu3 %v2049_v51 }
  0xdb   :  { %1336 = vmatpush.bf16.msra.mxu1 %v2066_v4 }
  0xdc   :  { %1319 = vmatpush.bf16.msra.mxu0 %v2056_v54  ;;  %1355 = vmatpush.bf16.msra.mxu2 %v2074_v5 }
  0xdd   :  { %1300 = vmatpush.bf16.msrb.mxu3 %v2048_v55 }
  0xdf   :  { %1337 = vmatpush.bf16.msra.mxu1 %v2065_v9 }
  0xe0   :  { %1356 = vmatpush.bf16.msra.mxu2 %v2073_v10 }
  0xe1   :  { %1369 = vmatpush.bf16.msra.mxu3 %v2087_v61 }
  0xe2   :  { %807 = vmatmul.bf16.gmra.mxu1 %v481_v29 }
  0xe3   :  { %826 = vmatmul.bf16.gmra.mxu2 %v493_v30  ;;  %1338 = vmatpush.bf16.msra.mxu1 %v2064_v16 }
  0xe4   :  { %1357 = vmatpush.bf16.msra.mxu2 %v2072_v17 }
  0xe5   :  { %1370 = vmatpush.bf16.msra.mxu3 %v2086_v3 }
  0xe9   :  { %1371 = vmatpush.bf16.msra.mxu3 %v2085_v8 }
  0xed   :  { %1372 = vmatpush.bf16.msra.mxu3 %v2084_v12 }
  0xf1   :  { %1373 = vmatpush.bf16.msra.mxu3 %v2083_v25 }
  0xf5   :  { %1374 = vmatpush.bf16.msra.mxu3 %v2082_v28 }
  0xf9   :  { %1375 = vmatpush.bf16.msra.mxu3 %v2081_v36 }
  0xfd   :  { %1376 = vmatpush.bf16.msra.mxu3 %v2080_v49 }
 0x13c   :  { %v784_v45 = vpop.f32.mrf.mxu0 }
 0x144   :  { %v786_v57 = vpop.f32.mrf.mxu0 }
 0x145   :  { %v765_v58 = vpop.f32.mrf.mxu3 }
 0x146   :  { %v766_v6 = vadd.f32 %v2100_v0, %v765_v58 }
 0x148   :  { %v785_v11 = vadd.f32 %v784_v45, %v766_v6 }
 0x14c   :  { %v789_v1 = vpop.f32.mrf.mxu0 }
 0x14d   :  { %v767_v2 = vpop.f32.mrf.mxu3 }
 0x14f   :  { %v803_v7 = vpop.f32.mrf.mxu1 }
 0x150   :  { %v804_v14 = vadd.f32 %v803_v7, %v785_v11 }
 0x154   :  { %v791_v13 = vpop.f32.mrf.mxu0 }
 0x155   :  { %v770_v15 = vpop.f32.mrf.mxu3 }
 0x156   :  { %v822_v21 = vpop.f32.mrf.mxu2  ;;  %v771_v33 = vadd.f32 %v2100_v0, %v770_v15 }
 0x157   :  { %v823_v22 = vadd.f32 %v822_v21, %v804_v14  ;;  %v805_v23 = vpop.f32.mrf.mxu1 }
 0x158   :  { %v790_v44 = vadd.f32 %v789_v1, %v771_v33 }
 0x159   :  { %v832_v26 = vmul.f32 0.01, %v823_v22 }
 0x15b   :  { %v836_v27 = vmax.f32 %v823_v22, %v832_v26 }
 0x15d   :  { %v2548_v29 = vsel %vm840_vm3, %v836_v27, 0.0  ;;  %v772_v30 = vpop.f32.mrf.mxu3 }
 0x15e   :  { %v856_v31 = vrot.slane %v2548_v29, 7  ;;  %v824_v32 = vpop.f32.mrf.mxu2  ;;  %v868_v35 = vpack.c.bf16 %v2548_v29, %v2548_v29  ;;  %v872_v57 = vrot.slane %v2548_v29, 1  ;;  %v884_v58 = vrot.slane %v2548_v29, 2 }
 0x15f   :  { %v808_v34 = vpop.f32.mrf.mxu1 }
 0x160   :  { %v862_v37 = vsel %vm411_vm2, %v856_v31, %v2370_v19  ;;  %v863_v38 = vsel %vm411_vm2, %v2370_v19, %v856_v31  ;;  %v925_v39 = vunpack.c.l.b16 %v868_v35  ;;  %v809_v50 = vadd.f32 %v808_v34, %v790_v44 }
 0x161   :  { %v864_v40 = vpack.c.bf16 %v863_v38, %v863_v38  ;;  %v865_v41 = vpack.c.bf16 %v862_v37, %v862_v37  ;;  %v878_v61 = vsel %vm206_vm0, %v872_v57, %v2390_v43  ;;  %v890_v62 = vsel %vm366_vm1, %v884_v58, %v2395_v47 }
 0x162   :  { %v929_v45 = vpack.c.b16 %v2375_v24, %v925_v39  ;;  %v880_v5 = vpack.c.bf16 %v878_v61, %v878_v61  ;;  %v892_v6 = vpack.c.bf16 %v890_v62, %v890_v62  ;;  %v879_v35 = vsel %vm206_vm0, %v2390_v43, %v872_v57 }
 0x163   :  { %v913_v46 = vunpack.c.l.b16 %v864_v40  ;;  %v914_v48 = vunpack.c.l.b16 %v865_v41  ;;  %v883_v39 = vpack.c.bf16 %v879_v35, %v879_v35  ;;  %v2088_v35 = vld [vmem:[%s2660_s7] sm:$0xff] }
 0x164   :  { %1320 = vmatmul.bf16.vlgmr.msra.gmra.mxu0 %v929_v45  ;;  %v937_v17 = vunpack.c.l.b16 %v880_v5  ;;  %v949_v22 = vunpack.c.l.b16 %v892_v6  ;;  %v2095_v5 = vld [vmem:[%s2660_s7 + $0x38] sm:$0xff] }
 0x165   :  { %v917_v51 = vpack.c.b16 %v914_v48, %v913_v46  ;;  %v940_v48 = vunpack.c.l.b16 %v883_v39  ;;  %1504 = vmatpush.bf16.msrb.mxu0 %v2095_v5 }
 0x166   :  { %v827_v53 = vpop.f32.mrf.mxu2 }
 0x167   :  { %v828_v54 = vadd.f32 %v827_v53, %v809_v50  ;;  %1301 = vmatmul.bf16.vlgmr.msrb.gmra.mxu3 %v917_v51  ;;  %v810_v55 = vpop.f32.mrf.mxu1 }
 0x169   :  { %v834_v59 = vmul.f32 0.01, %v828_v54 }
 0x16b   :  { %v838_v60 = vmax.f32 %v828_v54, %v834_v59 }
 0x16d   :  { %v854_v63 = vsel %vm842_vm4, %v838_v60, 0.0 }
 0x16e   :  { %v874_v0 = vrot.slane %v854_v63, 1  ;;  %v886_v1 = vrot.slane %v854_v63, 2  ;;  %v829_v2 = vpop.f32.mrf.mxu2  ;;  %v870_v3 = vpack.c.bf16 %v854_v63, %v854_v63  ;;  %v858_v4 = vrot.slane %v854_v63, 7 }
 0x16f   :  { %v898_v31 = vrot.slane %v854_v63, 3 }
 0x170   :  { %v927_v7 = vunpack.c.l.b16 %v870_v3  ;;  %v877_v8 = vsel %vm206_vm0, %v2390_v43, %v874_v0  ;;  %v889_v9 = vsel %vm366_vm1, %v2395_v47, %v886_v1  ;;  %v860_v10 = vsel %vm411_vm2, %v858_v4, %v2370_v19 }
 0x171   :  { %v861_v11 = vsel %vm411_vm2, %v2370_v19, %v858_v4  ;;  %v881_v12 = vpack.c.bf16 %v877_v8, %v877_v8  ;;  %v893_v13 = vpack.c.bf16 %v889_v9, %v889_v9  ;;  %v867_v16 = vpack.c.bf16 %v860_v10, %v860_v10  ;;  %v2101_v8 = vld [vmem:[%s2659_s6] ss:$0 sm:$0xff]  ;;  %v2094_v9 = vld [vmem:[%s2660_s7 + $0x30] sm:$0xff] }
 0x172   :  { %v930_v14 = vpack.c.b16 %v2375_v24, %v927_v7  ;;  %v866_v15 = vpack.c.bf16 %v861_v11, %v861_v11  ;;  %v896_v19 = vrot.slane %v2548_v29, 3  ;;  %v897_v24 = vrot.slane %v2129_v18, 3  ;;  %1505 = vmatpush.bf16.msrb.mxu0 %v2094_v9 }
 0x173   :  { %v938_v21 = vunpack.c.l.b16 %v881_v12  ;;  %v950_v23 = vunpack.c.l.b16 %v893_v13  ;;  %v916_v26 = vunpack.c.l.b16 %v867_v16  ;;  %v876_v32 = vsel %vm206_vm0, %v874_v0, %v2390_v43  ;;  %v2093_v12 = vld [vmem:[%s2660_s7 + $0x28] sm:$0xff]  ;;  %v2092_v16 = vld [vmem:[%s2660_s7 + $0x20] sm:$0xff] }
 0x174   :  { %v915_v25 = vunpack.c.l.b16 %v866_v15  ;;  %1325 = vmatmul.bf16.gmra.mxu0 %v930_v14  ;;  %v888_v33 = vsel %vm366_vm1, %v886_v1, %v2395_v47  ;;  %v902_v34 = vsel %vm900_vm5, %v897_v24, %v898_v31  ;;  %v891_v18 = vsel %vm366_vm1, %v2395_v47, %v884_v58 }
 0x175   :  { %v941_v27 = vpack.c.b16 %v938_v21, %v937_v17  ;;  %v953_v28 = vpack.c.b16 %v950_v23, %v949_v22  ;;  %v882_v29 = vpack.c.bf16 %v876_v32, %v876_v32  ;;  %v894_v36 = vpack.c.bf16 %v888_v33, %v888_v33  ;;  %v2091_v23 = vld [vmem:[%s2660_s7 + $0x18] sm:$0xff] }
 0x176   :  { %v918_v30 = vpack.c.b16 %v916_v26, %v915_v25  ;;  %v903_v37 = vsel %vm900_vm5, %v896_v19, %v897_v24  ;;  %v906_v38 = vpack.c.bf16 %v902_v34, %v902_v34  ;;  %v895_v40 = vpack.c.bf16 %v891_v18, %v891_v18  ;;  %1506 = vmatpush.bf16.msrb.mxu0 %v2093_v12 }
 0x177   :  { %1339 = vmatmul.bf16.vlgmr.msra.gmra.mxu1 %v941_v27  ;;  %1358 = vmatmul.bf16.vlgmr.msra.gmra.mxu2 %v953_v28  ;;  %v905_v41 = vpack.c.bf16 %v903_v37, %v903_v37  ;;  %v939_v44 = vunpack.c.l.b16 %v882_v29  ;;  %v951_v45 = vunpack.c.l.b16 %v894_v36  ;;  %v901_v47 = vsel %vm900_vm5, %v898_v31, %v897_v24 }
 0x178   :  { %1306 = vmatmul.bf16.gmra.mxu3 %v918_v30  ;;  %v962_v46 = vunpack.c.l.b16 %v906_v38  ;;  %v952_v49 = vunpack.c.l.b16 %v895_v40  ;;  %v904_v54 = vsel %vm900_vm5, %v897_v24, %v896_v19  ;;  %v907_v55 = vpack.c.bf16 %v901_v47, %v901_v47  ;;  %v2090_v30 = vld [vmem:[%s2660_s7 + $0x10] sm:$0xff]  ;;  %v2089_v19 = vld [vmem:[%s2660_s7 + $0x8] sm:$0xff] }
 0x179   :  { %v961_v50 = vunpack.c.l.b16 %v905_v41  ;;  %v942_v43 = vpack.c.b16 %v940_v48, %v939_v44  ;;  %v908_v57 = vpack.c.bf16 %v904_v54, %v904_v54 }
 0x17a   :  { %v954_v51 = vpack.c.b16 %v952_v49, %v951_v45  ;;  %v963_v58 = vunpack.c.l.b16 %v907_v55  ;;  %1507 = vmatpush.bf16.msrb.mxu0 %v2092_v16 }
 0x17b   :  { %v965_v53 = vpack.c.b16 %v962_v46, %v961_v50  ;;  %v964_v59 = vunpack.c.l.b16 %v908_v57 }
 0x17d   :  { %v966_v60 = vpack.c.b16 %v964_v59, %v963_v58 }
 0x17e   :  { %1508 = vmatpush.bf16.msrb.mxu0 %v2091_v23 }
 0x182   :  { %1509 = vmatpush.bf16.msrb.mxu0 %v2090_v30 }
 0x186   :  { %1510 = vmatpush.bf16.msrb.mxu0 %v2089_v19 }
 0x187   :  { %1344 = vmatmul.bf16.gmra.mxu1 %v942_v43  ;;  %1363 = vmatmul.bf16.gmra.mxu2 %v954_v51 }
 0x188   :  { %1377 = vmatmul.bf16.vlgmr.msra.gmra.mxu3 %v965_v53 }
 0x18a   :  { %1511 = vmatpush.bf16.msrb.mxu0 %v2088_v35 }
 0x198   :  { %1382 = vmatmul.bf16.gmra.mxu3 %v966_v60 }
 0x1e1   :  { %v1321_v61 = vpop.f32.mrf.mxu0 }
 0x1e9   :  { %v1323_v62 = vpop.f32.mrf.mxu0 }
 0x1ea   :  { %v1302_v63 = vpop.f32.mrf.mxu3 }
 0x1eb   :  { %v1303_v10 = vadd.f32 %v2101_v8, %v1302_v63 }
 0x1ed   :  { %v1322_v15 = vadd.f32 %v1321_v61, %v1303_v10 }
 0x1f1   :  { %v1326_v0 = vpop.f32.mrf.mxu0 }
 0x1f2   :  { %v1304_v1 = vpop.f32.mrf.mxu3 }
 0x1f4   :  { %v1340_v2 = vpop.f32.mrf.mxu1 }
 0x1f5   :  { %v1341_v17 = vadd.f32 %v1340_v2, %v1322_v15 }
 0x1f9   :  { %v1328_v3 = vpop.f32.mrf.mxu0 }
 0x1fa   :  { %v1359_v4 = vpop.f32.mrf.mxu2 }
 0x1fb   :  { %v1307_v6 = vpop.f32.mrf.mxu3  ;;  %v1360_v21 = vadd.f32 %v1359_v4, %v1341_v17 }
 0x1fc   :  { %v1342_v7 = vpop.f32.mrf.mxu1  ;;  %v1308_v24 = vadd.f32 %v2101_v8, %v1307_v6 }
 0x1fe   :  { %v1327_v29 = vadd.f32 %v1326_v0, %v1308_v24 }
 0x202   :  { %v1361_v11 = vpop.f32.mrf.mxu2 }
 0x203   :  { %v1309_v13 = vpop.f32.mrf.mxu3 }
 0x204   :  { %v1345_v14 = vpop.f32.mrf.mxu1 }
 0x205   :  { %v1346_v36 = vadd.f32 %v1345_v14, %v1327_v29 }
 0x20a   :  { %v1364_v22 = vpop.f32.mrf.mxu2 }
 0x20b   :  { %v1378_v25 = vpop.f32.mrf.mxu3  ;;  %v1365_v20 = vadd.f32 %v1364_v22, %v1346_v36 }
 0x20c   :  { %v1379_v26 = vadd.f32 %v1378_v25, %v1360_v21  ;;  %v1347_v27 = vpop.f32.mrf.mxu1 }
 0x20e   :  { %v1388_v28 = vmul.f32 0.01, %v1379_v26 }
 0x210   :  { %v1392_v31 = vmax.f32 %v1379_v26, %v1388_v28 }
 0x212   :  { %v1408_v32 = vsel %vm1396_vm6, %v1392_v31, -inf  ;;  %v1366_v33 = vpop.f32.mrf.mxu2 }
 0x213   :  { %v1380_v34 = vpop.f32.mrf.mxu3  ;;  %v1413_v18 = vrot.slane %v1408_v32, 4 }
 0x215   :  { %v1414_v56 = vmax.f32 %v1408_v32, %v1413_v18 }
 0x217   :  { %v1415_v39 = vrot.slane %v1414_v56, 2 }
 0x219   :  { %v1416_v44 = vmax.f32 %v1414_v56, %v1415_v39 }
 0x21b   :  { %v1383_v37 = vpop.f32.mrf.mxu3  ;;  %v1417_v49 = vrot.slane %v1416_v44, 1 }
 0x21c   :  { %v1384_v38 = vadd.f32 %v1383_v37, %v1365_v20 }
 0x21d   :  { %v1418_v51 = vmax.f32 %v1416_v44, %v1417_v49 }
 0x21e   :  { %v1390_v40 = vmul.f32 0.01, %v1384_v38 }
 0x21f   :  { %v1426_v54 = vpack.c.bf16 %v1418_v51, %v1418_v51 }
 0x220   :  { %v1394_v41 = vmax.f32 %v1384_v38, %v1390_v40 }
 0x221   :  { %v1450_v58 = vunpack.c.l.b16 %v1426_v54 }
 0x222   :  { %v1410_v45 = vsel %vm1398_vm7, %v1394_v41, -inf }
 0x223   :  { %v1420_v46 = vrot.slane %v1410_v45, 4  ;;  %v1385_v48 = vpop.f32.mrf.mxu3 }
 0x225   :  { %v1421_v50 = vmax.f32 %v1410_v45, %v1420_v46 }
 0x227   :  { %v1422_v43 = vrot.slane %v1421_v50, 2 }
 0x229   :  { %v1423_v53 = vmax.f32 %v1421_v50, %v1422_v43 }
 0x22b   :  { %v1424_v47 = vrot.slane %v1423_v53, 1 }
 0x22d   :  { %v1425_v55 = vmax.f32 %v1423_v53, %v1424_v47 }
 0x22f   :  { %v1427_v57 = vpack.c.bf16 %v1425_v55, %v1425_v55 }
 0x231   :  { %v1451_v59 = vunpack.c.l.b16 %v1427_v57 }
 0x233   :  { %v1453_v60 = vsel %vm1452_vm8, %v1451_v59, %v1450_v58 }
 0x234   :  { %v1454_v42 = vpack.c.b16 %v1453_v60, %v1453_v60 }
 0x236   :  { %1512 = vmatmul.bf16.vlgmr.msrb.gmra.mxu0 %v1454_v42 }
 0x2b3   :  { %v1513_v61 = vpop.f32.mrf.mxu0 }
 0x2b4   :  { %v1514_v62 = vadd.f32 %v2102_v52, %v1513_v61 }
 0x2b6   :  { %1517 = vst [vmem:[#allocation2] sm:$0x3] %v1514_v62 }
 0x2b7   :  { %1528 = dma.vmem_to_hbm [thread:$0]  %s1524_s14, 32, %s1526_s3, [#allocation3]  }
 0x2bb   :  { %v1515_v63 = vpop.f32.mrf.mxu0 }
 0x2bc   :  { %2127 = dma.done.wait [#allocation3], 32  }
 0x2bd   :  { %2128 = vsyncadd [#allocation3], 4294967264 }
 0x2be   :  { %1533 = vsyncpa [#allocation3], 1 }

</bundles_post_ra>
